<compile_context>
chip_gen: v7x
topology: tpu7x:2x2x1
jax: 0.10.0
libtpu: 0.0.40
codegen_flags: <defaults>
</compile_context>

<pallas_src>
import math

import jax
import jax.numpy as jnp
from jax.experimental import pallas as pl
from jax.experimental.pallas import tpu as pltpu

NEG_SLOPE = 0.1  # cfg.act_param for LeakyReLU (cfg.act_type == 'lrelu')


def _leaky(y, slope):
    return jnp.where(y >= 0, y, slope * y)


# ----------------------------- static geometry ------------------------------

def _conv_geometry(num_conv_layers, kernel_size, num_filters, seq_len):
    """Per-layer (static) geometry of the conv stack, PyTorch Conv1d rules."""
    geom = []
    L = seq_len
    for i in range(num_conv_layers):
        c_in = 1 if i == 0 else num_filters
        # first conv: padding = k//2 - 1 (and NO activation — it is not
        # wrapped in ConvLayerWithAct); hidden convs: padding = k//2 + LeakyReLU.
        pad = kernel_size // 2 - 1 if i == 0 else kernel_size // 2
        L_padded = L + 2 * pad
        L_out = L_padded - kernel_size + 1
        geom.append(dict(c_in=c_in, c_out=num_filters, pad=pad, L_in=L,
                         L_padded=L_padded, L_out=L_out, act=(i > 0)))
        L = L_out
    return geom


def _fc_activation_flags(num_fc_layers):
    if num_fc_layers == 1:
        return [False]
    return [True] * (num_fc_layers - 1) + [False]


# --------------------------- fused Pallas kernel -----------------------------

def make_fused_forward(*, batch, seq_len, num_conv_layers, num_fc_layers,
                       output_size, kernel_size, num_filters,
                       batch_tile=None, neg_slope=NEG_SLOPE):
    """Builds a single-pallas_call forward for the whole module."""
    geom = _conv_geometry(num_conv_layers, kernel_size, num_filters, seq_len)
    transition_size = output_size * num_filters
    L_last = geom[-1]["L_out"]
    assert num_filters * L_last == transition_size, (
        "conv output length must equal output_size so x1.view(-1, T) keeps "
        "the batch dimension (for odd kernel_size use seq_len = output_size + 2)")

    fc_acts = _fc_activation_flags(num_fc_layers)
    K = kernel_size
    Nc, Nf, F = num_conv_layers, num_fc_layers, num_filters
    L = seq_len

    # Batch tiling: one grid step per Bt samples; "parallel" so v7x can shard
    # the grid across its two TensorCores.
    if batch_tile is None:
        batch_tile = 8 if batch % 8 == 0 else batch
    assert batch % batch_tile == 0, "batch must be divisible by batch_tile"
    Bt = batch_tile
    n_tiles = batch // Bt

    # Static shapes of the pre-laid-out parameters (see prepare_fused_params).
    conv_w_shapes = [(g["c_in"] * K, F, g["L_out"]) for g in geom]
    conv_b_shapes = [(F, 1, g["L_out"]) for g in geom]
    fc_dims = [((transition_size if j == 0 else output_size), output_size)
               for j in range(Nf)]
    fc_w_shapes = [(din, dout) for (din, dout) in fc_dims]
    fc_b_shapes = [(1, dout) for (_, dout) in fc_dims]

    def kernel(*refs):
        it = iter(refs)
        x_ref = next(it)                          # VMEM (Bt, L)
        cw = [next(it) for _ in range(Nc)]        # VMEM (c_in*K, F, L_out_i)
        cb = [next(it) for _ in range(Nc)]        # VMEM (F, 1, L_out_i)
        fw = [next(it) for _ in range(Nf)]        # VMEM (din, dout)
        fb = [next(it) for _ in range(Nf)]        # VMEM (1, dout)
        o_ref = next(it)                          # VMEM (Bt, output_size)

        # ---- conv stack: everything stays in vregs (value space) ----
        h = x_ref[...][None, :, :]                # (1, Bt, L)
        if geom[0]["pad"] > 0:
            z = jnp.zeros((1, Bt, geom[0]["pad"]), jnp.float32)
            h = jnp.concatenate([z, h, z], axis=-1)

        x2 = None
        for i, g in enumerate(geom):
            c_in, c_out, L_out = g["c_in"], g["c_out"], g["L_out"]
            # Accumulator initialized with the bias (broadcast on first add).
            acc = cb[i][...]                      # (c_out, 1, L_out)
            for ci in range(c_in):
                h_ci = h[ci]                      # (Bt, L_padded)
                for kk in range(K):
                    t = ci * K + kk
                    wt = cw[i][t]                 # (c_out, L_out) lane-replicated
                    tap = h_ci[:, kk:kk + L_out]  # (Bt, L_out)
                    acc = acc + wt[:, None, :] * tap[None, :, :]
            if g["act"]:
                acc = _leaky(acc, neg_slope)      # (c_out, Bt, L_out)

            if i + 1 < Nc:
                pad_nxt = geom[i + 1]["pad"]
                if pad_nxt > 0:
                    z = jnp.zeros((c_out, Bt, pad_nxt), jnp.float32)
                    h = jnp.concatenate([z, acc, z], axis=-1)
                else:
                    h = acc
            else:
                # flatten (Bt, C, L_out) -> (Bt, C*L_out) row-major, matching
                # x1.view(-1, T); done as a lane concat in value space.
                x2 = jnp.concatenate([acc[co] for co in range(c_out)], axis=-1)

        # ---- FC stack (Dropout p=0.0 is the identity -> omitted) ----
        hfc = x2                                  # (Bt, transition_size)
        for j in range(Nf):
            y = jnp.dot(hfc, fw[j][...],
                        preferred_element_type=jnp.float32) + fb[j][...]
            if fc_acts[j]:
                y = _leaky(y, neg_slope)
            hfc = y
        o_ref[...] = hfc.astype(o_ref.dtype)

    def const_spec(shape):
        nd = len(shape)
        return pl.BlockSpec(shape, lambda i, nd=nd: (0,) * nd)

    in_specs = ([pl.BlockSpec((Bt, L), lambda i: (i, 0))]
                + [const_spec(s) for s in conv_w_shapes]
                + [const_spec(s) for s in conv_b_shapes]
                + [const_spec(s) for s in fc_w_shapes]
                + [const_spec(s) for s in fc_b_shapes])

    call = pl.pallas_call(
        kernel,
        out_shape=jax.ShapeDtypeStruct((batch, output_size), jnp.float32),
        grid=(n_tiles,),
        in_specs=in_specs,
        out_specs=pl.BlockSpec((Bt, output_size), lambda i: (i, 0)),
        compiler_params=pltpu.CompilerParams(
            dimension_semantics=("parallel",)),
        # No scratch_shapes: all intermediates live in vregs.
    )

    def forward(x, prepared):
        return call(x, *prepared["conv_w"], *prepared["conv_b"],
                    *prepared["fc_w"], *prepared["fc_b"])

    return forward


def prepare_fused_params(params, *, seq_len, kernel_size):
    """One-time host-side relayout (kept out of the per-call hot path):
    conv weights become (c_in*K, c_out, L_out) lane-replicated rows so each
    tap is one broadcast FMA over all output channels; conv biases become
    (c_out, 1, L_out) lane-replicated rows; FC weights are pre-transposed to
    (din, dout) and FC biases reshaped to (1, dout)."""
    num_conv_layers = len(params["conv"])
    num_filters = params["conv"][0]["w"].shape[0]
    geom = _conv_geometry(num_conv_layers, kernel_size, num_filters, seq_len)

    conv_w, conv_b = [], []
    for layer, g in zip(params["conv"], geom):
        w = layer["w"]                                  # (c_out, c_in, K)
        c_out, c_in, K = w.shape
        L_out = g["L_out"]
        wt = jnp.transpose(w, (1, 2, 0)).reshape(c_in * K, c_out)
        conv_w.append(jnp.broadcast_to(wt[:, :, None], (c_in * K, c_out, L_out)))
        conv_b.append(jnp.broadcast_to(layer["b"][:, None, None],
                                       (c_out, 1, L_out)))
    return {
        "conv_w": conv_w,
        "conv_b": conv_b,
        "fc_w": [jnp.transpose(l["w"]) for l in params["fc"]],
        "fc_b": [jnp.reshape(l["b"], (1, -1)) for l in params["fc"]],
    }


# -------------------------- module construction ----------------------------

def init_convolution_module(key, *, num_conv_layers, output_size, kernel_size,
                            num_filters, num_fc_layers, dtype=jnp.float32):
    assert num_conv_layers > 0 and num_fc_layers > 0
    assert output_size > 0 and kernel_size >= 3 and num_filters > 0
    keys = iter(jax.random.split(key, 2 * (num_conv_layers + num_fc_layers)))

    def conv_param(cin, cout, k):
        bound = 1.0 / math.sqrt(cin * k)
        w = jax.random.uniform(next(keys), (cout, cin, k), dtype, -bound, bound)
        b = jax.random.uniform(next(keys), (cout,), dtype, -bound, bound)
        return {"w": w, "b": b}

    def fc_param(din, dout):
        bound = 1.0 / math.sqrt(din)
        w = jax.random.uniform(next(keys), (dout, din), dtype, -bound, bound)
        b = jax.random.uniform(next(keys), (dout,), dtype, -bound, bound)
        return {"w": w, "b": b}

    params = {"conv": [], "fc": []}
    # first conv: Conv1d(1, F, k, pad=k//2-1), NO activation (not in Sequential)
    params["conv"].append(conv_param(1, num_filters, kernel_size))
    # hidden convs: Conv1d(F, F, k, pad=k//2) + LeakyReLU
    for _ in range(num_conv_layers - 1):
        params["conv"].append(conv_param(num_filters, num_filters, kernel_size))

    transition_size = output_size * num_filters
    if num_fc_layers > 1:
        params["fc"].append(fc_param(transition_size, output_size))   # +lrelu
        for _ in range(num_fc_layers - 2):
            params["fc"].append(fc_param(output_size, output_size))   # +lrelu
        params["fc"].append(fc_param(output_size, output_size))       # no act
    else:
        params["fc"].append(fc_param(transition_size, output_size))   # no act
    return params, transition_size


# --------------------------- pure-JAX reference -----------------------------

def reference_forward(x, params, *, kernel_size, transition_size,
                      num_fc_layers, neg_slope=NEG_SLOPE):
    def conv_ref(h, w, b, pad, act):
        hp = jnp.pad(h, ((0, 0), (0, 0), (pad, pad)))
        K = w.shape[-1]
        L_out = hp.shape[-1] - K + 1
        out = jnp.zeros((h.shape[0], w.shape[0], L_out), h.dtype)
        for k in range(K):
            out = out + jnp.einsum("oi,bil->bol", w[:, :, k],
                                   hp[:, :, k:k + L_out])
        out = out + b[None, :, None]
        return _leaky(out, neg_slope) if act else out

    h = x[:, None, :]
    h = conv_ref(h, params["conv"][0]["w"], params["conv"][0]["b"],
                 kernel_size // 2 - 1, False)
    for layer in params["conv"][1:]:
        h = conv_ref(h, layer["w"], layer["b"], kernel_size // 2, True)
    out = h.reshape(-1, transition_size)
    for layer, act in zip(params["fc"], _fc_activation_flags(num_fc_layers)):
        y = out @ layer["w"].T + layer["b"]
        out = _leaky(y, neg_slope) if act else y
    return out


# ---------------------------------- main ------------------------------------

if __name__ == "__main__":
    num_conv_layers = 2
    num_fc_layers = 2
    output_size = 16
    kernel_size = 3
    num_filters = 4
    batch = 16          # 2 grid steps of 8 samples each (parallel over TCs on v7x)

    key = jax.random.PRNGKey(0)
    pkey, xkey = jax.random.split(key)
    params, transition_size = init_convolution_module(
        pkey, num_conv_layers=num_conv_layers, output_size=output_size,
        kernel_size=kernel_size, num_filters=num_filters,
        num_fc_layers=num_fc_layers)

    # First conv (pad = k//2 - 1) shrinks the length by 2 (odd k); the flatten
    # requires conv output length == output_size  ->  L = output_size + 2.
    seq_len = output_size + 2
    x = jax.random.normal(xkey, (batch, seq_len), jnp.float32)

    forward = make_fused_forward(
        batch=batch, seq_len=seq_len, num_conv_layers=num_conv_layers,
        num_fc_layers=num_fc_layers, output_size=output_size,
        kernel_size=kernel_size, num_filters=num_filters)
    prepared = prepare_fused_params(params, seq_len=seq_len,
                                    kernel_size=kernel_size)

    out = forward(x, prepared)
    out = jax.block_until_ready(out)

    ref = reference_forward(
        x, params, kernel_size=kernel_size, transition_size=transition_size,
        num_fc_layers=num_fc_layers)

    assert out.shape == (batch, output_size)
    assert jnp.allclose(out, ref, atol=1e-4, rtol=1e-4), "mismatch vs reference"
    print("KERNEL_OK")
</pallas_src>

<mosaic_0001>
module attributes {stable_mosaic.version = 11 : i64} {
  func.func @kernel(%arg0: i32, %arg1: memref<8x18xf32, #tpu.memory_space<vmem>>, %arg2: memref<3x4x16xf32, #tpu.memory_space<vmem>>, %arg3: memref<12x4x16xf32, #tpu.memory_space<vmem>>, %arg4: memref<4x1x16xf32, #tpu.memory_space<vmem>>, %arg5: memref<4x1x16xf32, #tpu.memory_space<vmem>>, %arg6: memref<64x16xf32, #tpu.memory_space<vmem>>, %arg7: memref<16x16xf32, #tpu.memory_space<vmem>>, %arg8: memref<1x16xf32, #tpu.memory_space<vmem>>, %arg9: memref<1x16xf32, #tpu.memory_space<vmem>>, %arg10: memref<8x16xf32, #tpu.memory_space<vmem>>) attributes {dimension_semantics = [#tpu.dimension_semantics<parallel>], iteration_bounds = array<i64: 2>, scalar_prefetch = 0 : i64, scratch_operands = 0 : i64, tpu.core_type = #tpu.core_type<tc>, window_params = [{transform_indices = @transform_0, window_bounds = array<i64: 8, 18>}, {pipeline_mode = #tpu.pipeline_mode<synchronous>, transform_indices = @transform_1, window_bounds = array<i64: 3, 4, 16>}, {pipeline_mode = #tpu.pipeline_mode<synchronous>, transform_indices = @transform_2, window_bounds = array<i64: 12, 4, 16>}, {pipeline_mode = #tpu.pipeline_mode<synchronous>, transform_indices = @transform_3, window_bounds = array<i64: 4, 1, 16>}, {pipeline_mode = #tpu.pipeline_mode<synchronous>, transform_indices = @transform_4, window_bounds = array<i64: 4, 1, 16>}, {pipeline_mode = #tpu.pipeline_mode<synchronous>, transform_indices = @transform_5, window_bounds = array<i64: 64, 16>}, {pipeline_mode = #tpu.pipeline_mode<synchronous>, transform_indices = @transform_6, window_bounds = array<i64: 16, 16>}, {pipeline_mode = #tpu.pipeline_mode<synchronous>, transform_indices = @transform_7, window_bounds = array<i64: 1, 16>}, {pipeline_mode = #tpu.pipeline_mode<synchronous>, transform_indices = @transform_8, window_bounds = array<i64: 1, 16>}, {transform_indices = @transform_9, window_bounds = array<i64: 8, 16>}]} {
    %c0 = arith.constant 0 : index
    %c0_0 = arith.constant 0 : index
    %0 = vector.load %arg1[%c0, %c0_0] : memref<8x18xf32, #tpu.memory_space<vmem>>, vector<8x18xf32>
    %1 = vector.shape_cast %0 : vector<8x18xf32> to vector<1x8x18xf32>
    %c0_1 = arith.constant 0 : index
    %c0_2 = arith.constant 0 : index
    %c0_3 = arith.constant 0 : index
    %2 = vector.load %arg4[%c0_1, %c0_2, %c0_3] : memref<4x1x16xf32, #tpu.memory_space<vmem>>, vector<4x1x16xf32>
    %3 = vector.shape_cast %1 : vector<1x8x18xf32> to vector<8x18xf32>
    %c0_4 = arith.constant 0 : index
    %c0_5 = arith.constant 0 : index
    %c0_6 = arith.constant 0 : index
    %4 = vector.load %arg2[%c0_4, %c0_5, %c0_6] : memref<3x4x16xf32, #tpu.memory_space<vmem>>, vector<1x4x16xf32>
    %5 = vector.shape_cast %4 : vector<1x4x16xf32> to vector<4x16xf32>
    %6 = vector.extract_strided_slice %3 {offsets = [0, 0], sizes = [8, 16], strides = [1, 1]} : vector<8x18xf32> to vector<8x16xf32>
    %7 = vector.shape_cast %5 : vector<4x16xf32> to vector<4x1x16xf32>
    %8 = vector.shape_cast %6 : vector<8x16xf32> to vector<1x8x16xf32>
    %9 = vector.broadcast %7 : vector<4x1x16xf32> to vector<4x8x16xf32>
    %10 = vector.broadcast %8 : vector<1x8x16xf32> to vector<4x8x16xf32>
    %11 = arith.mulf %9, %10 : vector<4x8x16xf32>
    %12 = vector.broadcast %2 : vector<4x1x16xf32> to vector<4x8x16xf32>
    %13 = arith.addf %12, %11 : vector<4x8x16xf32>
    %c1 = arith.constant 1 : index
    %c0_7 = arith.constant 0 : index
    %c0_8 = arith.constant 0 : index
    %14 = vector.load %arg2[%c1, %c0_7, %c0_8] : memref<3x4x16xf32, #tpu.memory_space<vmem>>, vector<1x4x16xf32>
    %15 = vector.shape_cast %14 : vector<1x4x16xf32> to vector<4x16xf32>
    %16 = vector.extract_strided_slice %3 {offsets = [0, 1], sizes = [8, 16], strides = [1, 1]} : vector<8x18xf32> to vector<8x16xf32>
    %17 = vector.shape_cast %15 : vector<4x16xf32> to vector<4x1x16xf32>
    %18 = vector.shape_cast %16 : vector<8x16xf32> to vector<1x8x16xf32>
    %19 = vector.broadcast %17 : vector<4x1x16xf32> to vector<4x8x16xf32>
    %20 = vector.broadcast %18 : vector<1x8x16xf32> to vector<4x8x16xf32>
    %21 = arith.mulf %19, %20 : vector<4x8x16xf32>
    %22 = arith.addf %13, %21 : vector<4x8x16xf32>
    %c2 = arith.constant 2 : index
    %c0_9 = arith.constant 0 : index
    %c0_10 = arith.constant 0 : index
    %23 = vector.load %arg2[%c2, %c0_9, %c0_10] : memref<3x4x16xf32, #tpu.memory_space<vmem>>, vector<1x4x16xf32>
    %24 = vector.shape_cast %23 : vector<1x4x16xf32> to vector<4x16xf32>
    %25 = vector.extract_strided_slice %3 {offsets = [0, 2], sizes = [8, 16], strides = [1, 1]} : vector<8x18xf32> to vector<8x16xf32>
    %26 = vector.shape_cast %24 : vector<4x16xf32> to vector<4x1x16xf32>
    %27 = vector.shape_cast %25 : vector<8x16xf32> to vector<1x8x16xf32>
    %28 = vector.broadcast %26 : vector<4x1x16xf32> to vector<4x8x16xf32>
    %29 = vector.broadcast %27 : vector<1x8x16xf32> to vector<4x8x16xf32>
    %30 = arith.mulf %28, %29 : vector<4x8x16xf32>
    %31 = arith.addf %22, %30 : vector<4x8x16xf32>
    %cst = arith.constant 0.000000e+00 : f32
    %32 = vector.broadcast %cst : f32 to vector<4x8x1xf32>
    %33 = tpu.concatenate %32, %31, %32 in 2 : vector<4x8x1xf32>, vector<4x8x16xf32>, vector<4x8x1xf32> -> vector<4x8x18xf32>
    %c0_11 = arith.constant 0 : index
    %c0_12 = arith.constant 0 : index
    %c0_13 = arith.constant 0 : index
    %34 = vector.load %arg5[%c0_11, %c0_12, %c0_13] : memref<4x1x16xf32, #tpu.memory_space<vmem>>, vector<4x1x16xf32>
    %35 = vector.extract_strided_slice %33 {offsets = [0, 0, 0], sizes = [1, 8, 18], strides = [1, 1, 1]} : vector<4x8x18xf32> to vector<1x8x18xf32>
    %36 = vector.shape_cast %35 : vector<1x8x18xf32> to vector<8x18xf32>
    %c0_14 = arith.constant 0 : index
    %c0_15 = arith.constant 0 : index
    %c0_16 = arith.constant 0 : index
    %37 = vector.load %arg3[%c0_14, %c0_15, %c0_16] : memref<12x4x16xf32, #tpu.memory_space<vmem>>, vector<1x4x16xf32>
    %38 = vector.shape_cast %37 : vector<1x4x16xf32> to vector<4x16xf32>
    %39 = vector.extract_strided_slice %36 {offsets = [0, 0], sizes = [8, 16], strides = [1, 1]} : vector<8x18xf32> to vector<8x16xf32>
    %40 = vector.shape_cast %38 : vector<4x16xf32> to vector<4x1x16xf32>
    %41 = vector.shape_cast %39 : vector<8x16xf32> to vector<1x8x16xf32>
    %42 = vector.broadcast %40 : vector<4x1x16xf32> to vector<4x8x16xf32>
    %43 = vector.broadcast %41 : vector<1x8x16xf32> to vector<4x8x16xf32>
    %44 = arith.mulf %42, %43 : vector<4x8x16xf32>
    %45 = vector.broadcast %34 : vector<4x1x16xf32> to vector<4x8x16xf32>
    %46 = arith.addf %45, %44 : vector<4x8x16xf32>
    %c1_17 = arith.constant 1 : index
    %c0_18 = arith.constant 0 : index
    %c0_19 = arith.constant 0 : index
    %47 = vector.load %arg3[%c1_17, %c0_18, %c0_19] : memref<12x4x16xf32, #tpu.memory_space<vmem>>, vector<1x4x16xf32>
    %48 = vector.shape_cast %47 : vector<1x4x16xf32> to vector<4x16xf32>
    %49 = vector.extract_strided_slice %36 {offsets = [0, 1], sizes = [8, 16], strides = [1, 1]} : vector<8x18xf32> to vector<8x16xf32>
    %50 = vector.shape_cast %48 : vector<4x16xf32> to vector<4x1x16xf32>
    %51 = vector.shape_cast %49 : vector<8x16xf32> to vector<1x8x16xf32>
    %52 = vector.broadcast %50 : vector<4x1x16xf32> to vector<4x8x16xf32>
    %53 = vector.broadcast %51 : vector<1x8x16xf32> to vector<4x8x16xf32>
    %54 = arith.mulf %52, %53 : vector<4x8x16xf32>
    %55 = arith.addf %46, %54 : vector<4x8x16xf32>
    %c2_20 = arith.constant 2 : index
    %c0_21 = arith.constant 0 : index
    %c0_22 = arith.constant 0 : index
    %56 = vector.load %arg3[%c2_20, %c0_21, %c0_22] : memref<12x4x16xf32, #tpu.memory_space<vmem>>, vector<1x4x16xf32>
    %57 = vector.shape_cast %56 : vector<1x4x16xf32> to vector<4x16xf32>
    %58 = vector.extract_strided_slice %36 {offsets = [0, 2], sizes = [8, 16], strides = [1, 1]} : vector<8x18xf32> to vector<8x16xf32>
    %59 = vector.shape_cast %57 : vector<4x16xf32> to vector<4x1x16xf32>
    %60 = vector.shape_cast %58 : vector<8x16xf32> to vector<1x8x16xf32>
    %61 = vector.broadcast %59 : vector<4x1x16xf32> to vector<4x8x16xf32>
    %62 = vector.broadcast %60 : vector<1x8x16xf32> to vector<4x8x16xf32>
    %63 = arith.mulf %61, %62 : vector<4x8x16xf32>
    %64 = arith.addf %55, %63 : vector<4x8x16xf32>
    %65 = vector.extract_strided_slice %33 {offsets = [1, 0, 0], sizes = [1, 8, 18], strides = [1, 1, 1]} : vector<4x8x18xf32> to vector<1x8x18xf32>
    %66 = vector.shape_cast %65 : vector<1x8x18xf32> to vector<8x18xf32>
    %c3 = arith.constant 3 : index
    %c0_23 = arith.constant 0 : index
    %c0_24 = arith.constant 0 : index
    %67 = vector.load %arg3[%c3, %c0_23, %c0_24] : memref<12x4x16xf32, #tpu.memory_space<vmem>>, vector<1x4x16xf32>
    %68 = vector.shape_cast %67 : vector<1x4x16xf32> to vector<4x16xf32>
    %69 = vector.extract_strided_slice %66 {offsets = [0, 0], sizes = [8, 16], strides = [1, 1]} : vector<8x18xf32> to vector<8x16xf32>
    %70 = vector.shape_cast %68 : vector<4x16xf32> to vector<4x1x16xf32>
    %71 = vector.shape_cast %69 : vector<8x16xf32> to vector<1x8x16xf32>
    %72 = vector.broadcast %70 : vector<4x1x16xf32> to vector<4x8x16xf32>
    %73 = vector.broadcast %71 : vector<1x8x16xf32> to vector<4x8x16xf32>
    %74 = arith.mulf %72, %73 : vector<4x8x16xf32>
    %75 = arith.addf %64, %74 : vector<4x8x16xf32>
    %c4 = arith.constant 4 : index
    %c0_25 = arith.constant 0 : index
    %c0_26 = arith.constant 0 : index
    %76 = vector.load %arg3[%c4, %c0_25, %c0_26] : memref<12x4x16xf32, #tpu.memory_space<vmem>>, vector<1x4x16xf32>
    %77 = vector.shape_cast %76 : vector<1x4x16xf32> to vector<4x16xf32>
    %78 = vector.extract_strided_slice %66 {offsets = [0, 1], sizes = [8, 16], strides = [1, 1]} : vector<8x18xf32> to vector<8x16xf32>
    %79 = vector.shape_cast %77 : vector<4x16xf32> to vector<4x1x16xf32>
    %80 = vector.shape_cast %78 : vector<8x16xf32> to vector<1x8x16xf32>
    %81 = vector.broadcast %79 : vector<4x1x16xf32> to vector<4x8x16xf32>
    %82 = vector.broadcast %80 : vector<1x8x16xf32> to vector<4x8x16xf32>
    %83 = arith.mulf %81, %82 : vector<4x8x16xf32>
    %84 = arith.addf %75, %83 : vector<4x8x16xf32>
    %c5 = arith.constant 5 : index
    %c0_27 = arith.constant 0 : index
    %c0_28 = arith.constant 0 : index
    %85 = vector.load %arg3[%c5, %c0_27, %c0_28] : memref<12x4x16xf32, #tpu.memory_space<vmem>>, vector<1x4x16xf32>
    %86 = vector.shape_cast %85 : vector<1x4x16xf32> to vector<4x16xf32>
    %87 = vector.extract_strided_slice %66 {offsets = [0, 2], sizes = [8, 16], strides = [1, 1]} : vector<8x18xf32> to vector<8x16xf32>
    %88 = vector.shape_cast %86 : vector<4x16xf32> to vector<4x1x16xf32>
    %89 = vector.shape_cast %87 : vector<8x16xf32> to vector<1x8x16xf32>
    %90 = vector.broadcast %88 : vector<4x1x16xf32> to vector<4x8x16xf32>
    %91 = vector.broadcast %89 : vector<1x8x16xf32> to vector<4x8x16xf32>
    %92 = arith.mulf %90, %91 : vector<4x8x16xf32>
    %93 = arith.addf %84, %92 : vector<4x8x16xf32>
    %94 = vector.extract_strided_slice %33 {offsets = [2, 0, 0], sizes = [1, 8, 18], strides = [1, 1, 1]} : vector<4x8x18xf32> to vector<1x8x18xf32>
    %95 = vector.shape_cast %94 : vector<1x8x18xf32> to vector<8x18xf32>
    %c6 = arith.constant 6 : index
    %c0_29 = arith.constant 0 : index
    %c0_30 = arith.constant 0 : index
    %96 = vector.load %arg3[%c6, %c0_29, %c0_30] : memref<12x4x16xf32, #tpu.memory_space<vmem>>, vector<1x4x16xf32>
    %97 = vector.shape_cast %96 : vector<1x4x16xf32> to vector<4x16xf32>
    %98 = vector.extract_strided_slice %95 {offsets = [0, 0], sizes = [8, 16], strides = [1, 1]} : vector<8x18xf32> to vector<8x16xf32>
    %99 = vector.shape_cast %97 : vector<4x16xf32> to vector<4x1x16xf32>
    %100 = vector.shape_cast %98 : vector<8x16xf32> to vector<1x8x16xf32>
    %101 = vector.broadcast %99 : vector<4x1x16xf32> to vector<4x8x16xf32>
    %102 = vector.broadcast %100 : vector<1x8x16xf32> to vector<4x8x16xf32>
    %103 = arith.mulf %101, %102 : vector<4x8x16xf32>
    %104 = arith.addf %93, %103 : vector<4x8x16xf32>
    %c7 = arith.constant 7 : index
    %c0_31 = arith.constant 0 : index
    %c0_32 = arith.constant 0 : index
    %105 = vector.load %arg3[%c7, %c0_31, %c0_32] : memref<12x4x16xf32, #tpu.memory_space<vmem>>, vector<1x4x16xf32>
    %106 = vector.shape_cast %105 : vector<1x4x16xf32> to vector<4x16xf32>
    %107 = vector.extract_strided_slice %95 {offsets = [0, 1], sizes = [8, 16], strides = [1, 1]} : vector<8x18xf32> to vector<8x16xf32>
    %108 = vector.shape_cast %106 : vector<4x16xf32> to vector<4x1x16xf32>
    %109 = vector.shape_cast %107 : vector<8x16xf32> to vector<1x8x16xf32>
    %110 = vector.broadcast %108 : vector<4x1x16xf32> to vector<4x8x16xf32>
    %111 = vector.broadcast %109 : vector<1x8x16xf32> to vector<4x8x16xf32>
    %112 = arith.mulf %110, %111 : vector<4x8x16xf32>
    %113 = arith.addf %104, %112 : vector<4x8x16xf32>
    %c8 = arith.constant 8 : index
    %c0_33 = arith.constant 0 : index
    %c0_34 = arith.constant 0 : index
    %114 = vector.load %arg3[%c8, %c0_33, %c0_34] : memref<12x4x16xf32, #tpu.memory_space<vmem>>, vector<1x4x16xf32>
    %115 = vector.shape_cast %114 : vector<1x4x16xf32> to vector<4x16xf32>
    %116 = vector.extract_strided_slice %95 {offsets = [0, 2], sizes = [8, 16], strides = [1, 1]} : vector<8x18xf32> to vector<8x16xf32>
    %117 = vector.shape_cast %115 : vector<4x16xf32> to vector<4x1x16xf32>
    %118 = vector.shape_cast %116 : vector<8x16xf32> to vector<1x8x16xf32>
    %119 = vector.broadcast %117 : vector<4x1x16xf32> to vector<4x8x16xf32>
    %120 = vector.broadcast %118 : vector<1x8x16xf32> to vector<4x8x16xf32>
    %121 = arith.mulf %119, %120 : vector<4x8x16xf32>
    %122 = arith.addf %113, %121 : vector<4x8x16xf32>
    %123 = vector.extract_strided_slice %33 {offsets = [3, 0, 0], sizes = [1, 8, 18], strides = [1, 1, 1]} : vector<4x8x18xf32> to vector<1x8x18xf32>
    %124 = vector.shape_cast %123 : vector<1x8x18xf32> to vector<8x18xf32>
    %c9 = arith.constant 9 : index
    %c0_35 = arith.constant 0 : index
    %c0_36 = arith.constant 0 : index
    %125 = vector.load %arg3[%c9, %c0_35, %c0_36] : memref<12x4x16xf32, #tpu.memory_space<vmem>>, vector<1x4x16xf32>
    %126 = vector.shape_cast %125 : vector<1x4x16xf32> to vector<4x16xf32>
    %127 = vector.extract_strided_slice %124 {offsets = [0, 0], sizes = [8, 16], strides = [1, 1]} : vector<8x18xf32> to vector<8x16xf32>
    %128 = vector.shape_cast %126 : vector<4x16xf32> to vector<4x1x16xf32>
    %129 = vector.shape_cast %127 : vector<8x16xf32> to vector<1x8x16xf32>
    %130 = vector.broadcast %128 : vector<4x1x16xf32> to vector<4x8x16xf32>
    %131 = vector.broadcast %129 : vector<1x8x16xf32> to vector<4x8x16xf32>
    %132 = arith.mulf %130, %131 : vector<4x8x16xf32>
    %133 = arith.addf %122, %132 : vector<4x8x16xf32>
    %c10 = arith.constant 10 : index
    %c0_37 = arith.constant 0 : index
    %c0_38 = arith.constant 0 : index
    %134 = vector.load %arg3[%c10, %c0_37, %c0_38] : memref<12x4x16xf32, #tpu.memory_space<vmem>>, vector<1x4x16xf32>
    %135 = vector.shape_cast %134 : vector<1x4x16xf32> to vector<4x16xf32>
    %136 = vector.extract_strided_slice %124 {offsets = [0, 1], sizes = [8, 16], strides = [1, 1]} : vector<8x18xf32> to vector<8x16xf32>
    %137 = vector.shape_cast %135 : vector<4x16xf32> to vector<4x1x16xf32>
    %138 = vector.shape_cast %136 : vector<8x16xf32> to vector<1x8x16xf32>
    %139 = vector.broadcast %137 : vector<4x1x16xf32> to vector<4x8x16xf32>
    %140 = vector.broadcast %138 : vector<1x8x16xf32> to vector<4x8x16xf32>
    %141 = arith.mulf %139, %140 : vector<4x8x16xf32>
    %142 = arith.addf %133, %141 : vector<4x8x16xf32>
    %c11 = arith.constant 11 : index
    %c0_39 = arith.constant 0 : index
    %c0_40 = arith.constant 0 : index
    %143 = vector.load %arg3[%c11, %c0_39, %c0_40] : memref<12x4x16xf32, #tpu.memory_space<vmem>>, vector<1x4x16xf32>
    %144 = vector.shape_cast %143 : vector<1x4x16xf32> to vector<4x16xf32>
    %145 = vector.extract_strided_slice %124 {offsets = [0, 2], sizes = [8, 16], strides = [1, 1]} : vector<8x18xf32> to vector<8x16xf32>
    %146 = vector.shape_cast %144 : vector<4x16xf32> to vector<4x1x16xf32>
    %147 = vector.shape_cast %145 : vector<8x16xf32> to vector<1x8x16xf32>
    %148 = vector.broadcast %146 : vector<4x1x16xf32> to vector<4x8x16xf32>
    %149 = vector.broadcast %147 : vector<1x8x16xf32> to vector<4x8x16xf32>
    %150 = arith.mulf %148, %149 : vector<4x8x16xf32>
    %151 = arith.addf %142, %150 : vector<4x8x16xf32>
    %cst_41 = arith.constant 0.000000e+00 : f32
    %152 = vector.broadcast %cst_41 : f32 to vector<4x8x16xf32>
    %153 = arith.cmpf oge, %151, %152 : vector<4x8x16xf32>
    %cst_42 = arith.constant 1.000000e-01 : f32
    %154 = vector.broadcast %cst_42 : f32 to vector<4x8x16xf32>
    %155 = arith.mulf %154, %151 : vector<4x8x16xf32>
    %156 = arith.select %153, %151, %155 : vector<4x8x16xi1>, vector<4x8x16xf32>
    %157 = vector.extract_strided_slice %156 {offsets = [0, 0, 0], sizes = [1, 8, 16], strides = [1, 1, 1]} : vector<4x8x16xf32> to vector<1x8x16xf32>
    %158 = vector.shape_cast %157 : vector<1x8x16xf32> to vector<8x16xf32>
    %159 = vector.extract_strided_slice %156 {offsets = [1, 0, 0], sizes = [1, 8, 16], strides = [1, 1, 1]} : vector<4x8x16xf32> to vector<1x8x16xf32>
    %160 = vector.shape_cast %159 : vector<1x8x16xf32> to vector<8x16xf32>
    %161 = vector.extract_strided_slice %156 {offsets = [2, 0, 0], sizes = [1, 8, 16], strides = [1, 1, 1]} : vector<4x8x16xf32> to vector<1x8x16xf32>
    %162 = vector.shape_cast %161 : vector<1x8x16xf32> to vector<8x16xf32>
    %163 = vector.extract_strided_slice %156 {offsets = [3, 0, 0], sizes = [1, 8, 16], strides = [1, 1, 1]} : vector<4x8x16xf32> to vector<1x8x16xf32>
    %164 = vector.shape_cast %163 : vector<1x8x16xf32> to vector<8x16xf32>
    %165 = tpu.concatenate %158, %160, %162, %164 in 1 : vector<8x16xf32>, vector<8x16xf32>, vector<8x16xf32>, vector<8x16xf32> -> vector<8x64xf32>
    %c0_43 = arith.constant 0 : index
    %c0_44 = arith.constant 0 : index
    %166 = vector.load %arg6[%c0_43, %c0_44] : memref<64x16xf32, #tpu.memory_space<vmem>>, vector<64x16xf32>
    %cst_45 = arith.constant dense<0.000000e+00> : vector<8x16xf32>
    %167 = tpu.matmul %165, %166, %cst_45 {dimension_numbers = #tpu.dot_dimension_numbers<[1], [0], [0], [1], [0, 0, 1, 1], [], []>} : vector<8x64xf32>, vector<64x16xf32>, vector<8x16xf32> -> vector<8x16xf32>
    %c0_46 = arith.constant 0 : index
    %c0_47 = arith.constant 0 : index
    %168 = vector.load %arg8[%c0_46, %c0_47] : memref<1x16xf32, #tpu.memory_space<vmem>>, vector<1x16xf32>
    %169 = vector.broadcast %168 : vector<1x16xf32> to vector<8x16xf32>
    %170 = arith.addf %167, %169 : vector<8x16xf32>
    %cst_48 = arith.constant 0.000000e+00 : f32
    %171 = vector.broadcast %cst_48 : f32 to vector<8x16xf32>
    %172 = arith.cmpf oge, %170, %171 : vector<8x16xf32>
    %cst_49 = arith.constant 1.000000e-01 : f32
    %173 = vector.broadcast %cst_49 : f32 to vector<8x16xf32>
    %174 = arith.mulf %173, %170 : vector<8x16xf32>
    %175 = arith.select %172, %170, %174 : vector<8x16xi1>, vector<8x16xf32>
    %c0_50 = arith.constant 0 : index
    %c0_51 = arith.constant 0 : index
    %176 = vector.load %arg7[%c0_50, %c0_51] : memref<16x16xf32, #tpu.memory_space<vmem>>, vector<16x16xf32>
    %cst_52 = arith.constant dense<0.000000e+00> : vector<8x16xf32>
    %177 = tpu.matmul %175, %176, %cst_52 {dimension_numbers = #tpu.dot_dimension_numbers<[1], [0], [0], [1], [0, 0, 1, 1], [], []>} : vector<8x16xf32>, vector<16x16xf32>, vector<8x16xf32> -> vector<8x16xf32>
    %c0_53 = arith.constant 0 : index
    %c0_54 = arith.constant 0 : index
    %178 = vector.load %arg9[%c0_53, %c0_54] : memref<1x16xf32, #tpu.memory_space<vmem>>, vector<1x16xf32>
    %179 = vector.broadcast %178 : vector<1x16xf32> to vector<8x16xf32>
    %180 = arith.addf %177, %179 : vector<8x16xf32>
    %c0_55 = arith.constant 0 : index
    %c0_56 = arith.constant 0 : index
    %181 = vector.load %arg10[%c0_55, %c0_56] : memref<8x16xf32, #tpu.memory_space<vmem>>, vector<8x16xf32>
    tpu.vector_store %arg10[%c0_55, %c0_56], %180 {strides = array<i32>} : memref<8x16xf32, #tpu.memory_space<vmem>>, vector<8x16xf32>,
    return
  }
  func.func @transform_0(%arg0: i32) -> (i32, i32) {
    %c0_i32 = arith.constant 0 : i32
    %c0_i32_0 = arith.constant 0 : i32
    return %arg0, %c0_i32 : i32, i32
  }
  func.func @transform_1(%arg0: i32) -> (i32, i32, i32) {
    %c0_i32 = arith.constant 0 : i32
    %c0_i32_0 = arith.constant 0 : i32
    %c0_i32_1 = arith.constant 0 : i32
    %c0_i32_2 = arith.constant 0 : i32
    return %c0_i32, %c0_i32_0, %c0_i32_1 : i32, i32, i32
  }
  func.func @transform_2(%arg0: i32) -> (i32, i32, i32) {
    %c0_i32 = arith.constant 0 : i32
    %c0_i32_0 = arith.constant 0 : i32
    %c0_i32_1 = arith.constant 0 : i32
    %c0_i32_2 = arith.constant 0 : i32
    return %c0_i32, %c0_i32_0, %c0_i32_1 : i32, i32, i32
  }
  func.func @transform_3(%arg0: i32) -> (i32, i32, i32) {
    %c0_i32 = arith.constant 0 : i32
    %c0_i32_0 = arith.constant 0 : i32
    %c0_i32_1 = arith.constant 0 : i32
    %c0_i32_2 = arith.constant 0 : i32
    return %c0_i32, %c0_i32_0, %c0_i32_1 : i32, i32, i32
  }
  func.func @transform_4(%arg0: i32) -> (i32, i32, i32) {
    %c0_i32 = arith.constant 0 : i32
    %c0_i32_0 = arith.constant 0 : i32
    %c0_i32_1 = arith.constant 0 : i32
    %c0_i32_2 = arith.constant 0 : i32
    return %c0_i32, %c0_i32_0, %c0_i32_1 : i32, i32, i32
  }
  func.func @transform_5(%arg0: i32) -> (i32, i32) {
    %c0_i32 = arith.constant 0 : i32
    %c0_i32_0 = arith.constant 0 : i32
    %c0_i32_1 = arith.constant 0 : i32
    return %c0_i32, %c0_i32_0 : i32, i32
  }
  func.func @transform_6(%arg0: i32) -> (i32, i32) {
    %c0_i32 = arith.constant 0 : i32
    %c0_i32_0 = arith.constant 0 : i32
    %c0_i32_1 = arith.constant 0 : i32
    return %c0_i32, %c0_i32_0 : i32, i32
  }
  func.func @transform_7(%arg0: i32) -> (i32, i32) {
    %c0_i32 = arith.constant 0 : i32
    %c0_i32_0 = arith.constant 0 : i32
    %c0_i32_1 = arith.constant 0 : i32
    return %c0_i32, %c0_i32_0 : i32, i32
  }
  func.func @transform_8(%arg0: i32) -> (i32, i32) {
    %c0_i32 = arith.constant 0 : i32
    %c0_i32_0 = arith.constant 0 : i32
    %c0_i32_1 = arith.constant 0 : i32
    return %c0_i32, %c0_i32_0 : i32, i32
  }
  func.func @transform_9(%arg0: i32) -> (i32, i32) {
    %c0_i32 = arith.constant 0 : i32
    %c0_i32_0 = arith.constant 0 : i32
    return %arg0, %c0_i32 : i32, i32
  }
}

</mosaic_0001>

<bundles_post_ra>
// kernel: tpu_custom_call.1
= control target key start
LH: loop header
LB: loop body
LE: loop exit
PB: predicated region body
PF: predicated region fallthrough
CT: control target
= control target key end

     0   :  { %s2707_s0 = inlined_call_operand.vmem [shape: f32[16,18], index: 0, kind: input, shape index: {}]   ;;  %s2708_s1 = inlined_call_operand.hbm [shape: f32[3,4,16], index: 1, kind: input, shape index: {}]   ;;  %s2709_s2 = inlined_call_operand.vmem [shape: f32[12,4,16], index: 2, kind: input, shape index: {}]   ;;  %s2710_s3 = inlined_call_operand.hbm [shape: f32[4,1,16], index: 3, kind: input, shape index: {}]   ;;  %s2711_s4 = inlined_call_operand.hbm [shape: f32[4,1,16], index: 4, kind: input, shape index: {}]   ;;  %s2712_s5 = inlined_call_operand.vmem [shape: f32[64,16], index: 5, kind: input, shape index: {}]   ;;  %s2713_s6 = inlined_call_operand.vmem [shape: f32[16,16], index: 6, kind: input, shape index: {}]   ;;  %s2714_s7 = inlined_call_operand.vmem [shape: f32[1,16], index: 7, kind: input, shape index: {}]   ;;  %s2715_s8 = inlined_call_operand.vmem [shape: f32[1,16], index: 8, kind: input, shape index: {}]   ;;  %s2716_s9 = inlined_call_operand.hbm [shape: f32[16,16], index: 9, kind: output, shape index: {}]  }
   0x1   :  { %2726 = sst [smem:[#allocation16_spill]] %s2710_s3 }
   0x2   :  { %14 = vsyncpa [#allocation3], 0 }
   0x3   :  { %15 = vsyncpa [#allocation6], 0 }
   0x4   :  { %16 = vsyncpa [#allocation4], 0 }
   0x5   :  { %18 = vsyncpa [#allocation4 + $0x1], 0  ;;  %s2037_s30 = smov 0   ;;  %s2039_s10 = smov 0  }
   0x6   :  { %s2041_s11 = smov 0   ;;  %s2043_s12 = smov 0  }
   0x7 LB: > { %2727 = sst [smem:[#allocation12_spill]] %s1963_s11  ;;  %s2058_s13 = sadd.s32 4294967295, %s1967_s12   ;;  %s1967_s12 = sphi %s2043_s12, %s2758_s12   ;;  %s1963_s11 = sphi %s2041_s11, %s2760_s11   ;;  %s1959_s10 = sphi %s2039_s10, %s2762_s10   ;;  %s1955_s30 = sphi %s2037_s30, %s2761_s30  }
   0x8   : > { %s1622_s14 = sadd.s32 4294967294, %s1967_s12   ;;  %s2062_s15 = sadd.s32 1, %s1967_s12  }
   0x9   : > { %2728 = sst [smem:[#allocation13_spill]] %s2062_s15  ;;  %s225_s16 = sadd.s32 1, %s1963_s11 }
   0xa   : > { %s222_s17 = ssub.s32 %s1967_s12, %s2062_s15  ;;  %p235_p0 = scmp.ne.s32.totalorder %s1963_s11, %s1959_s10 }
   0xb   : > { %p223_p1 = scmp.eq.s32.totalorder %s222_s17, 0  ;;  %p236_p2 = scmp.eq.s32.totalorder %s2058_s13, 1 }
   0xc   : > { %p241_p3 = scmp.ne.s32.totalorder %s1959_s10, %s1955_s30  ;;  %p242_p4 = scmp.eq.s32.totalorder %s1622_s14, 1 }
   0xd   : > { %s2073_s18 = scalar_select %p223_p1, %s1963_s11, %s225_s16  }
   0xe   : > { %p2075_p5 = por %p236_p2, %p235_p0  ;;  %p2079_p6 = por %p242_p4, %p241_p3 }
   0xf   : > { %2729 = sst [smem:[#allocation14_spill]] %s2073_s18  ;;  %p1623_p7 = scmp.ge.s32.totalorder %s1967_s12, 1 }
  0x10   : > { %s2730_s19 = scalar_select %p2075_p5, 1, 0 }
  0x11   : > { %s2731_s20 = scalar_select %p2079_p6, 1, 0 }
  0x12   : > { %p249_p8 = scmp.lt.s32.totalorder %s1967_s12, 3  ;;  %p2717_p9 = scmp.eq.s32.totalorder %s2058_s13, 0 }
  0x13   : > { %2732 = sst [smem:[#allocation15_spill]] %s2731_s20  ;;  %s1969_s22 = smov [#allocation5]  }
  0x14   : > { %p2086_p10 = pnand %p1623_p7, %p249_p8  ;;  %s277_s23 = sshll.u32 %s1969_s22, 4  ;;  %s278_s23 = int_to_ptr.vmem [resolvable:$true] %s277_s23 }
  0x15   : > { %s1970_s25 = smov [#allocation2]   ;;  %s2735_s3 = sld [smem:[#allocation16_spill]] }
  0x16   : > { %s2733_s21 = scalar_select %p2086_p10, 1, 0 }
  0x17   : > { %p1743_p11 = pneg %p2086_p10  ;;  %s261_s26 = sshll.u32 %s1970_s25, 4  ;;  %s2098_s26 = int_to_ptr.vmem [resolvable:$true] %s261_s26 }
  0x19   : > { %p2094_p12 = pnand %p2717_p9, %p1743_p11 }
  0x1b   : > { %s1813_s29 = scalar_lea.hbm %s2735_s3, 64  ;;  %p2108_p0 = pneg %p2094_p12 }
  0x1c   : > { %p1814_p13 = scmp.ne.s32.totalorder %s2735_s3, %s1813_s29  ;;  %p1820_p3 = scmp.lt.u32.totalorder %s1813_s29, %s2735_s3 }
  0x1e   : > { %p1816_p1 = pnand %p2108_p0, %p1814_p13 }
  0x20   : > { %p1817_p2 = pneg %p1816_p1 }
  0x22   : > { %p1822_p4 = pnand %p1820_p3, %p1817_p2 }
  0x24   : > { %1825 = shalt.err (!%p1822_p4)
}
  0x25   : > { %s1826_s27 = scalar_lea.vmem %s278_s23, 64  ;;  %p1834_p9 = scmp.lt.s32.totalorder %s278_s23, %s278_s23 }
  0x26   : > { %p1827_p7 = scmp.ne.s32.totalorder %s278_s23, %s1826_s27  ;;  %p1835_p6 = scmp.lt.s32.totalorder %s1826_s27, %s1826_s27 }
  0x28   : > { %p1829_p8 = pnand %p1827_p7, %p2108_p0  ;;  %p1836_p5 = por %p1835_p6, %p1834_p9 }
  0x2a   : > { %p1830_p11 = pneg %p1829_p8 }
  0x2c   : > { %p1837_p10 = pnand %p1836_p5, %p1830_p11 }
  0x2e   : > { %1840 = shalt.err (!%p1837_p10)
}
  0x2f   : > { %s2724_s28 = smov 16   ;;  %s2725_s14 = smov 1  }
  0x30   : > { %1749 = dma.hbm_to_vmem [thread:$0]  (!%p2094_p12), %s2735_s3, 64, %s278_s23, [#allocation6], %s2724_s28, %s2724_s28, %s2725_s14  }
  0x31   : > { %s1841_s18 = scalar_lea.hbm %s2708_s1, 192 }
  0x32   : > { %p1842_p5 = scmp.ne.s32.totalorder %s2708_s1, %s1841_s18  ;;  %p1848_p10 = scmp.lt.u32.totalorder %s1841_s18, %s2708_s1 }
  0x34   : > { %p1844_p6 = pnand %p1842_p5, %p2108_p0 }
  0x36   : > { %p1845_p9 = pneg %p1844_p6 }
  0x38   : > { %p1850_p13 = pnand %p1848_p10, %p1845_p9 }
  0x3a   : > { %1853 = shalt.err (!%p1850_p13)
}
  0x3b   : > { %s1854_s23 = scalar_lea.vmem %s2098_s26, 192  ;;  %p1862_p4 = scmp.lt.s32.totalorder %s2098_s26, %s2098_s26 }
  0x3c   : > { %p1855_p1 = scmp.ne.s32.totalorder %s2098_s26, %s1854_s23  ;;  %p1863_p7 = scmp.lt.s32.totalorder %s1854_s23, %s1854_s23 }
  0x3e   : > { %p1857_p2 = pnand %p1855_p1, %p2108_p0  ;;  %p1864_p8 = por %p1863_p7, %p1862_p4 }
  0x40   : > { %p1858_p3 = pneg %p1857_p2 }
  0x42   : > { %p1865_p11 = pnand %p1864_p8, %p1858_p3 }
  0x44   : > { %1868 = shalt.err (!%p1865_p11)
}
  0x45   : > { %s1973_s11 = smov 64   ;;  %s1974_s15 = smov 4  }
  0x46   : > { %1746 = dma.hbm_to_vmem [thread:$0]  (!%p2094_p12), %s2708_s1, 192, %s2098_s26, [#allocation3], %s1973_s11, %s1973_s11, %s1974_s15  }
  0x47   : > { %s1975_s29 = smov [#allocation7]   ;;  %s1869_s27 = scalar_lea.hbm %s2711_s4, 64 }
  0x48   : > { %s290_s16 = sshll.u32 %s1975_s29, 4  ;;  %p1870_p5 = scmp.ne.s32.totalorder %s2711_s4, %s1869_s27  ;;  %s291_s16 = int_to_ptr.vmem [resolvable:$true] %s290_s16 }
  0x49   : > { %p1876_p10 = scmp.lt.u32.totalorder %s1869_s27, %s2711_s4 }
  0x4a   : > { %p1872_p6 = pnand %p1870_p5, %p2108_p0 }
  0x4c   : > { %p1873_p9 = pneg %p1872_p6 }
  0x4e   : > { %p1878_p13 = pnand %p1876_p10, %p1873_p9 }
  0x50   : > { %1881 = shalt.err (!%p1878_p13)
}
  0x51   : > { %s1882_s26 = scalar_lea.vmem %s291_s16, 64  ;;  %p1890_p4 = scmp.lt.s32.totalorder %s291_s16, %s291_s16 }
  0x52   : > { %p1883_p1 = scmp.ne.s32.totalorder %s291_s16, %s1882_s26  ;;  %p1891_p7 = scmp.lt.s32.totalorder %s1882_s26, %s1882_s26 }
  0x54   : > { %p1885_p2 = pnand %p1883_p1, %p2108_p0  ;;  %p1892_p8 = por %p1891_p7, %p1890_p4 }
  0x56   : > { %p1886_p3 = pneg %p1885_p2 }
  0x58   : > { %p1893_p11 = pnand %p1892_p8, %p1886_p3 }
  0x5a   : > { %1896 = shalt.err (!%p1893_p11)
}
  0x5b   : > { %s2737_s28 = smov 1   ;;  %s2738_s11 = smov 16  }
  0x5c   : > { %1752 = dma.hbm_to_vmem [thread:$0]  (!%p2094_p12), %s2711_s4, 64, %s291_s16, [#allocation6], %s2738_s11, %s2738_s11, %s2737_s28  }
  0x5d   : > { %p2739_p5 = scmp.ne.s32.totalorder %s2733_s21, 0 }
  0x5e   : > { %p2740_p0 = scmp.eq.s32.totalorder (!%p2739_p5), %s2058_s13, 0 }
  0x5f   : > { %325 = sbr.rel (%p2739_p5) target bundleno = 1063 (0x427), region = 56 }
  0x66   : > { %1942 = dma.done.wait (%p2740_p0), [#allocation3], 192   ;;  %p2741_p6 = pmov %p2740_p0 }
  0x67   : > { %p2742_p9 = pmov %p2740_p0 }
  0x68   : > { %1944 = vsyncadd (%p2741_p6), [#allocation3], 4294967104 }
  0x69   : > { %1946 = dma.done.wait (%p2742_p9), [#allocation6], 128   ;;  %p2743_p10 = pmov %p2740_p0 }
  0x6a   : > { %p368_p13 = scmp.lt.s32.totalorder %s2058_s13, 1  ;;  %s1976_s20 = smov 127   ;;  %v1978_v1 = vmov 1966171168   ;;  %v390_v3 = vlaneseq  ;;  %v1637_v30 = vld [vmem:[#allocation5 + $0x2] ss:$0 sm:$0xff] }
  0x6b   : > { %1948 = vsyncadd (%p2743_p10), [#allocation6], 4294967168  ;;  %s1977_s29 = smov 126   ;;  %v388_v2 = vunpack.c.l.s4 %v1978_v1  ;;  %v1635_v31 = vld [vmem:[#allocation5] ss:$0 sm:$0xff]  ;;  %s1979_s16 = smov 1  }
  0x6c   : > { %s369_s24 = scalar_select %p368_p13, %s2058_s13, 1  ;;  %v391_v5 = vshrl.u32 %v390_v3, 7  ;;  %v1634_v7 = vld.sshfl [vmem:[#allocation2] sm:$0x33 pattern:$0x75316420] }
  0x6d   : > { %v389_v4 = vunpack.c.0.s8 %v388_v2  ;;  %v1639_v9 = vld.sshfl [vmem:[#allocation2 + $0x4] sm:$0x33 pattern:$0x75316420]  ;;  %v386_v10 = vcombine.high %v1634_v7, %v1634_v7  ;;  %v1636_v44 = vld [vmem:[#allocation5 + $0x1] ss:$0 sm:$0xff] }
  0x6e   : > { %s1633_s17 = sshll.u32 %s369_s24, 3  ;;  %v2191_v11 = vsub.s32 0, %v391_v5  ;;  %v465_v14 = vcombine.high %v1639_v9, %v1639_v9  ;;  %v1640_v15 = vld.sshfl [vmem:[#allocation2 + $0x8] sm:$0x33 pattern:$0x75316420] }
  0x6f   : > { %s371_s18 = scalar_lea.vmem %s2707_s0, %s1633_s17  ;;  %v2188_v6 = vsub.s32 %v389_v4, %v391_v5  ;;  %v524_v22 = vcombine.high %v1640_v15, %v1640_v15  ;;  %v1638_v56 = vld [vmem:[#allocation5 + $0x3] ss:$0 sm:$0xff]  ;;  %v1657_v4 = vld.sshfl [vmem:[%s2709_s2 + $0x18] sm:$0x33 pattern:$0x75316420] }
  0x70   : > { %v372_v0 = vld [vmem:[%s371_s18] sm:$0xff]  ;;  %vm588_vm0 = vcmask 7168   ;;  %vm593_vm1 = vcmask 138240   ;;  %vm1981_vm2 = vmmov 0   ;;  %s1983_s11 = smov 32   ;;  %s1984_s3 = smov 16  }
  0x71   : > { %503 = vrot.lane.b32.xlu0 %v372_v0, %s1976_s20  ;;  %v393_v8 = vrot.slane %v1634_v7, %v2188_v6  ;;  %v472_v12 = vrot.slane %v1639_v9, %v2188_v6  ;;  %v531_v16 = vrot.slane %v1640_v15, %v2188_v6  ;;  %v400_v17 = vrot.slane %v386_v10, %v2188_v6  ;;  %v1641_v7 = vld.sshfl [vmem:[%s2709_s2] sm:$0x33 pattern:$0x75316420]  ;;  %s1985_s14 = smov 48   ;;  %s1673_s27 = sshll.u32 %s2058_s13, 7 }
  0x72   : > { %v479_v21 = vrot.slane %v465_v14, %v2188_v6  ;;  %v538_v33 = vrot.slane %v524_v22, %v2188_v6  ;;  %v2214_v5 = vrot.slane %v1657_v4, %v2188_v6  ;;  %v1651_v14 = vld.sshfl [vmem:[%s2709_s2 + $0xc] sm:$0x33 pattern:$0x75316420]  ;;  %vm1337_vm7 = vcmask 130048   ;;  %p2755_p1 = scmp.ne.s32.totalorder %s2730_s19, 0 }
  0x73   : > { %v401_v13 = vcombine.high %v393_v8, %v393_v8  ;;  %v480_v18 = vcombine.high %v472_v12, %v472_v12  ;;  %v406_v20 = vrot.slane %v393_v8, %v2191_v11  ;;  %v539_v23 = vcombine.high %v531_v16, %v531_v16  ;;  %s1986_s13 = smov [#allocation8]  }
  0x74   : > { %v410_v24 = vrot.slane %v400_v17, %v2191_v11  ;;  %v402_v25 = vcombine.high %v400_v17, %v400_v17  ;;  %v485_v29 = vrot.slane %v472_v12, %v2191_v11  ;;  %v481_v32 = vcombine.high %v479_v21, %v479_v21  ;;  %s1901_s17 = sshll.u32 %s1986_s13, 4  ;;  %s1902_s17 = int_to_ptr.vmem [resolvable:$false] %s1901_s17 }
  0x75   : > { %561 = vrot.lane.b32.xlu0 %v372_v0, %s1977_s29  ;;  %v414_v19 = vrot.slane %v401_v13, %v2191_v11  ;;  %v493_v26 = vrot.slane %v480_v18, %v2191_v11  ;;  %v423_v28 = vmul.f32 %v406_v20, %v372_v0  ;;  %v544_v34 = vrot.slane %v531_v16, %v2191_v11  ;;  %s1903_s15 = scalar_lea.vmem %s1902_s17, 256 }
  0x76   : > { %v489_v35 = vrot.slane %v479_v21, %v2191_v11  ;;  %v552_v37 = vrot.slane %v539_v23, %v2191_v11  ;;  %v424_v38 = vmul.f32 %v410_v24, %v372_v0  ;;  %v418_v39 = vrot.slane %v402_v25, %v2191_v11  ;;  %v1663_v24 = vld.sshfl [vmem:[%s2709_s2 + $0x24] sm:$0x33 pattern:$0x75316420] }
  0x77   : > { %v425_v27 = vmul.f32 %v414_v19, %v372_v0  ;;  %v451_v42 = vadd.f32 %v1635_v31, %v423_v28  ;;  %v540_v45 = vcombine.high %v538_v33, %v538_v33  ;;  %v548_v46 = vrot.slane %v538_v33, %v2191_v11 }
  0x78   : > { %v497_v47 = vrot.slane %v481_v32, %v2191_v11  ;;  %v452_v50 = vadd.f32 %v1636_v44, %v424_v38  ;;  %v426_v51 = vmul.f32 %v418_v39, %v372_v0  ;;  %v2220_v8 = vrot.slane %v1641_v7, %v2188_v6  ;;  %v1346_v39 = vld [vmem:[%s2712_s5 + $0x18] sm:$0xff] }
  0x79   : > { %v453_v41 = vadd.f32 %v1637_v30, %v425_v27  ;;  %v556_v57 = vrot.slane %v540_v45, %v2191_v11  ;;  %v999_v9 = vrot.slane %v2214_v5, %v2191_v11  ;;  %v2232_v17 = vrot.slane %v1651_v14, %v2188_v6 }
  0x7a   : > { %v454_v63 = vadd.f32 %v1638_v56, %v426_v51  ;;  %v631_v12 = vrot.slane %v2220_v8, %v2191_v11  ;;  %v979_v44 = vcombine.high %v1657_v4, %v1657_v4  ;;  %v611_v45 = vcombine.high %v1641_v7, %v1641_v7 }
  0x7b   : > { %v827_v21 = vrot.slane %v2232_v17, %v2191_v11  ;;  %v626_v56 = vcombine.high %v2220_v8, %v2220_v8  ;;  %vm1339_vm8 = vcmask 261120   ;;  %vm1341_vm9 = vcmask 392192  }
  0x7c   : > { %vm1358_vm10 = vcmask 523264  }
  0x7d   : > { %v639_v8 = vrot.slane %v626_v56, %v2191_v11 }
  0xe3   : > { %v504_v36 = vpop.permute.xlu0 %503 }
  0xe4   : > { %v508_v40 = vmul.f32 %v504_v36, %v493_v26  ;;  %v506_v43 = vmul.f32 %v504_v36, %v485_v29  ;;  %v507_v48 = vmul.f32 %v504_v36, %v489_v35  ;;  %v509_v61 = vmul.f32 %v504_v36, %v497_v47  ;;  %v1344_v35 = vld [vmem:[%s2712_s5 + $0x8] sm:$0xff]  ;;  %v1345_v36 = vld [vmem:[%s2712_s5 + $0x10] sm:$0xff] }
  0xe5   : > { %v2257_v26 = vrot.slane %v1663_v24, %v2188_v6  ;;  %v2305_v47 = vrot.slane %v979_v44, %v2188_v6 }
  0xe6   : > { %v512_v53 = vadd.f32 %v508_v40, %v453_v41  ;;  %v510_v54 = vadd.f32 %v506_v43, %v451_v42  ;;  %v511_v62 = vadd.f32 %v507_v48, %v452_v50  ;;  %v513_v0 = vadd.f32 %v509_v61, %v454_v63  ;;  %v1347_v41 = vld [vmem:[%s2712_s5 + $0x20] sm:$0xff]  ;;  %v1348_v42 = vld [vmem:[%s2712_s5 + $0x28] sm:$0xff] }
  0xe7   : > { %v562_v49 = vpop.permute.xlu0 %561  ;;  %v1171_v29 = vrot.slane %v2257_v26, %v2191_v11  ;;  %v1718_v40 = vpack.c.bf16 %v1346_v39, %v1345_v36  ;;  %v1721_v43 = vpack.c.bf16 %v1348_v42, %v1347_v41  ;;  %v1647_v48 = vld.sshfl [vmem:[%s2709_s2 + $0x4] sm:$0x33 pattern:$0x75316420]  ;;  %v1151_v50 = vcombine.high %v1663_v24, %v1663_v24 }
  0xe8   : > { %v566_v52 = vmul.f32 %v562_v49, %v552_v37  ;;  %v564_v55 = vmul.f32 %v562_v49, %v544_v34  ;;  %v565_v58 = vmul.f32 %v562_v49, %v548_v46  ;;  %v567_v1 = vmul.f32 %v562_v49, %v556_v57  ;;  %v1343_v34 = vld [vmem:[%s2712_s5] sm:$0xff]  ;;  %v1653_v57 = vld.sshfl [vmem:[%s2709_s2 + $0x10] sm:$0x33 pattern:$0x75316420] }
  0xe9   : > { %v1980_v37 = vmov 0.0|0.0   ;;  %v1715_v38 = vpack.c.bf16 %v1344_v35, %v1343_v34  ;;  %v807_v46 = vcombine.high %v1651_v14, %v1651_v14  ;;  %v2311_v49 = vrot.slane %v611_v45, %v2188_v6 }
  0xea   : > { %v570_v59 = vadd.f32 %v566_v52, %v512_v53  ;;  %v568_v60 = vadd.f32 %v564_v55, %v510_v54  ;;  %v569_v2 = vadd.f32 %v565_v58, %v511_v62  ;;  %v571_v3 = vadd.f32 %v567_v1, %v513_v0  ;;  %1714 = vmatprep.subr.bf16.mxu0 %v1980_v37  ;;  %v1649_v53 = vld.sshfl [vmem:[%s2709_s2 + $0x8] sm:$0x33 pattern:$0x75316420] }
  0xeb   : > { %1726 = vmatprep.subr.bf16.mxu1 %v1980_v37  ;;  %1716 = vmatpush3.bf16.msra.mxu0 %v1715_v38  ;;  %v2314_v51 = vrot.slane %v807_v46, %v2188_v6  ;;  %v690_v52 = vcombine.high %v1647_v48, %v1647_v48  ;;  %v994_v54 = vcombine.high %v2214_v5, %v2214_v5  ;;  %v1655_v62 = vld.sshfl [vmem:[%s2709_s2 + $0x14] sm:$0x33 pattern:$0x75316420] }
  0xec   : > { %580 = vrot.lane.b32.xlu0 %v570_v59, %s1979_s16  ;;  %576 = vrot.lane.b32.xlu1 %v568_v60, %s1979_s16  ;;  %v995_v55 = vcombine.high %v2305_v47, %v2305_v47  ;;  %v1003_v58 = vrot.slane %v2305_v47, %v2191_v11  ;;  %v627_v59 = vcombine.high %v2311_v49, %v2311_v49 }
  0xed   : > { %1717 = vmatprep.subr.bf16.mxu0 %v1980_v37  ;;  %v2333_v60 = vrot.slane %v1151_v50, %v2188_v6  ;;  %v749_v61 = vcombine.high %v1649_v53, %v1649_v53  ;;  %v822_v63 = vcombine.high %v2232_v17, %v2232_v17  ;;  %v823_v1 = vcombine.high %v2314_v51, %v2314_v51 }
  0xee   : > { %v2346_v0 = vrot.slane %v690_v52, %v2188_v6  ;;  %v2352_v4 = vrot.slane %v995_v55, %v2191_v11  ;;  %v635_v5 = vrot.slane %v2311_v49, %v2191_v11  ;;  %v862_v7 = vcombine.high %v1653_v57, %v1653_v57 }
  0xef   : > { %1719 = vmatpush3.bf16.msra.mxu0 %v1718_v40  ;;  %v643_v14 = vrot.slane %v627_v59, %v2191_v11  ;;  %v2371_v17 = vrot.slane %v749_v61, %v2188_v6 }
  0xf0   : > { %578 = vrot.lane.b32.xlu1 %v569_v2, %s1979_s16  ;;  %1720 = vmatprep.subr.bf16.mxu0 %v1980_v37  ;;  %v2343_v2 = vrot.slane %v1647_v48, %v2188_v6 }
  0xf1   : > { %v765_v41 = vcombine.high %v2371_v17, %v2371_v17 }
  0xf2   : > { %v705_v24 = vcombine.high %v2343_v2, %v2343_v2  ;;  %v710_v40 = vrot.slane %v2343_v2, %v2191_v11 }
  0xf3   : > { %1722 = vmatpush3.bf16.msra.mxu0 %v1721_v43  ;;  %v714_v43 = vrot.slane %v2346_v0, %v2191_v11  ;;  %v781_v59 = vrot.slane %v765_v41, %v2191_v11 }
  0xf4   : > { %582 = vrot.lane.b32.xlu1 %v571_v3, %s1979_s16  ;;  %1723 = vmatprep.subr.bf16.mxu0 %v1980_v37  ;;  %v2349_v3 = vrot.slane %v994_v54, %v2191_v11  ;;  %v2400_v37 = vrot.slane %v1655_v62, %v2188_v6  ;;  %v2415_v44 = vrot.slane %v705_v24, %v2191_v11 }
  0xf6   : > { %v936_v56 = vcombine.high %v2400_v37, %v2400_v37 }
 0x15e   : > { %v581_v10 = vpop.permute.xlu0 %580  ;;  %v577_v13 = vpop.permute.xlu1 %576 }
 0x15f   : > { %v591_v15 = vsel %vm588_vm0, 0.0, %v581_v10  ;;  %v589_v16 = vsel %vm588_vm0, 0.0, %v577_v13  ;;  %v2360_v10 = vrot.slane %v1649_v53, %v2188_v6  ;;  %v1659_v13 = vld.sshfl [vmem:[%s2709_s2 + $0x1c] sm:$0x33 pattern:$0x75316420] }
 0x160   : > { %v2235_v18 = vsel %vm593_vm1, %v591_v15, 0.0  ;;  %v2238_v19 = vsel %vm593_vm1, %v589_v16, 0.0  ;;  %v831_v15 = vrot.slane %v2314_v51, %v2191_v11  ;;  %v1167_v16 = vcombine.high %v2333_v60, %v2333_v60  ;;  %v1665_v53 = vld.sshfl [vmem:[%s2709_s2 + $0x28] sm:$0x33 pattern:$0x75316420] }
 0x161   : > { %v2241_v20 = vmul.f32 %v999_v9, %v2235_v18  ;;  %786 = vrot.lane.b32.xlu1 %v2238_v19, %s1977_s29  ;;  %v2248_v22 = vmul.f32 %v631_v12, %v2238_v19  ;;  %728 = vrot.lane.b32.xlu0 %v2238_v19, %s1976_s20  ;;  %v1166_v9 = vcombine.high %v2257_v26, %v2257_v26  ;;  %v1661_v26 = vld.sshfl [vmem:[%s2709_s2 + $0x20] sm:$0x33 pattern:$0x75316420] }
 0x162   : > { %v579_v23 = vpop.permute.xlu1 %578  ;;  %v921_v12 = vcombine.high %v1655_v62, %v1655_v62  ;;  %v1034_v34 = vcombine.high %v1659_v13, %v1659_v13  ;;  %v764_v36 = vcombine.high %v2360_v10, %v2360_v10  ;;  %v2406_v39 = vrot.slane %v1167_v16, %v2191_v11 }
 0x163   : > { %v590_v25 = vsel %vm588_vm0, 0.0, %v579_v23  ;;  %v2377_v23 = vrot.slane %v823_v1, %v2191_v11  ;;  %v2395_v35 = vrot.slane %v1166_v9, %v2191_v11  ;;  %v1093_v42 = vcombine.high %v1661_v26, %v1661_v26  ;;  %v1667_v1 = vld.sshfl [vmem:[%s2709_s2 + $0x2c] sm:$0x33 pattern:$0x75316420] }
 0x164   : > { %v2260_v27 = vsel %vm593_vm1, %v590_v25, 0.0  ;;  %v706_v25 = vcombine.high %v2346_v0, %v2346_v0  ;;  %v2403_v38 = vrot.slane %v921_v12, %v2188_v6  ;;  %v769_v46 = vrot.slane %v2360_v10, %v2191_v11  ;;  %v1644_v9 = vld [vmem:[#allocation7 + $0x2] ss:$0 sm:$0xff] }
 0x165   : > { %v2263_v28 = vmul.f32 %v827_v21, %v2260_v27  ;;  %958 = vrot.lane.b32.xlu1 %v2260_v27, %s1977_s29  ;;  %900 = vrot.lane.b32.xlu0 %v2260_v27, %s1976_s20  ;;  %v2374_v21 = vrot.slane %v822_v63, %v2191_v11  ;;  %v2427_v50 = vrot.slane %v1659_v13, %v2188_v6 }
 0x166   : > { %v583_v30 = vpop.permute.xlu1 %582  ;;  %v2418_v45 = vrot.slane %v706_v25, %v2191_v11  ;;  %v2430_v52 = vrot.slane %v1034_v34, %v2188_v6  ;;  %v2438_v55 = vrot.slane %v764_v36, %v2191_v11  ;;  %v2448_v62 = vrot.slane %v1661_v26, %v2188_v6 }
 0x167   : > { %v592_v31 = vsel %vm588_vm0, 0.0, %v583_v30  ;;  %v2389_v30 = vrot.slane %v1653_v57, %v2188_v6  ;;  %v937_v57 = vcombine.high %v2403_v38, %v2403_v38  ;;  %v2451_v63 = vrot.slane %v1093_v42, %v2188_v6 }
 0x168   : > { %v2273_v32 = vsel %vm593_vm1, %v592_v31, 0.0  ;;  %v2392_v31 = vrot.slane %v862_v7, %v2188_v6  ;;  %v1206_v12 = vcombine.high %v1665_v53, %v1665_v53  ;;  %v1049_v24 = vcombine.high %v2427_v50, %v2427_v50  ;;  %v1642_v7 = vld [vmem:[#allocation7] ss:$0 sm:$0xff] }
 0x169   : > { %v2276_v33 = vmul.f32 %v1171_v29, %v2273_v32  ;;  %1130 = vrot.lane.b32.xlu1 %v2235_v18, %s1977_s29  ;;  %1072 = vrot.lane.b32.xlu0 %v2235_v18, %s1976_s20  ;;  %v877_v48 = vcombine.high %v2389_v30, %v2389_v30  ;;  %v1050_v25 = vcombine.high %v2430_v52, %v2430_v52 }
 0x16a   : > { %v878_v49 = vcombine.high %v2392_v31, %v2392_v31  ;;  %v2473_v26 = vrot.slane %v936_v56, %v2191_v11  ;;  %v2476_v34 = vrot.slane %v937_v57, %v2191_v11  ;;  %v2479_v36 = vrot.slane %v1665_v53, %v2188_v6  ;;  %v1643_v57 = vld [vmem:[#allocation7 + $0x1] ss:$0 sm:$0xff] }
 0x16b   : > { %v2463_v13 = vrot.slane %v877_v48, %v2191_v11  ;;  %v1265_v41 = vcombine.high %v1667_v1, %v1667_v1  ;;  %v649_v42 = vmul.f32 %v635_v5, %v2238_v19  ;;  %v1109_v10 = vcombine.high %v2451_v63, %v2451_v63 }
 0x16c   : > { %v2466_v16 = vrot.slane %v878_v49, %v2191_v11  ;;  %v1108_v49 = vcombine.high %v2448_v62, %v2448_v62  ;;  %v650_v56 = vmul.f32 %v639_v8, %v2238_v19  ;;  %v2494_v5 = vrot.slane %v1206_v12, %v2188_v6 }
 0x16d   : > { %1302 = vrot.lane.b32.xlu1 %v2273_v32, %s1977_s29  ;;  %1244 = vrot.lane.b32.xlu0 %v2273_v32, %s1976_s20  ;;  %v651_v48 = vmul.f32 %v643_v14, %v2238_v19  ;;  %v2498_v29 = vrot.slane %v1049_v24, %v2191_v11  ;;  %v2501_v54 = vrot.slane %v1050_v25, %v2191_v11  ;;  %v1645_v14 = vld [vmem:[#allocation7 + $0x3] ss:$0 sm:$0xff]  ;;  %s365_s29 = sand.u32 1, %s1959_s10  }
 0x16e   : > { %v2509_v53 = vmul.f32 %v1003_v58, %v2235_v18  ;;  %v2513_v12 = vmul.f32 %v2349_v3, %v2235_v18  ;;  %v2517_v19 = vmul.f32 %v2352_v4, %v2235_v18  ;;  %v1221_v24 = vcombine.high %v2479_v36, %v2479_v36  ;;  %s1632_s20 = sshll.u32 %s365_s29, 3 }
 0x16f   : > { %v676_v25 = vadd.f32 %v1642_v7, %v2248_v22  ;;  %v677_v8 = vadd.f32 %v1643_v57, %v649_v42  ;;  %v2523_v61 = vrot.slane %v1108_v49, %v2191_v11  ;;  %v2526_v47 = vrot.slane %v1109_v10, %v2191_v11  ;;  %s367_s23 = scalar_lea.vmem [#allocation8], %s1632_s20 }
 0x170   : > { %v845_v58 = vmul.f32 %v831_v15, %v2260_v27  ;;  %v846_v18 = vmul.f32 %v2374_v21, %v2260_v27  ;;  %v678_v3 = vadd.f32 %v1644_v9, %v650_v56  ;;  %v1222_v4 = vcombine.high %v2494_v5, %v2494_v5  ;;  %s1532_s26 = sshll.u32 %s367_s23, 4  ;;  %s2666_s26 = int_to_ptr.vmem [resolvable:$true] %s1532_s26 }
 0x171   : > { %v847_v22 = vmul.f32 %v2377_v23, %v2260_v27  ;;  %v679_v7 = vadd.f32 %v1645_v14, %v651_v48  ;;  %v1226_v10 = vrot.slane %v2479_v36, %v2191_v11  ;;  %v2543_v57 = vrot.slane %v1221_v24, %v2191_v11  ;;  %s1897_s24 = scalar_lea.vmem %s2666_s26, 128  ;;  %p1904_p4 = scmp.lt.s32.totalorder %s2666_s26, %s1902_s17 }
 0x172   : > { %v2546_v21 = vrot.slane %v1667_v1, %v2188_v6  ;;  %v2549_v9 = vrot.slane %v1265_v41, %v2188_v6  ;;  %v2744_v56 = vrot.slane %v2371_v17, %v2191_v11  ;;  %v2564_v41 = vrot.slane %v1222_v4, %v2191_v11  ;;  %p1898_p12 = scmp.ne.s32.totalorder %s2666_s26, %s1897_s24  ;;  %p1905_p7 = scmp.lt.s32.totalorder %s1903_s15, %s1897_s24 }
 0x173   : > { %v2574_v17 = vmul.f32 %v2395_v35, %v2273_v32  ;;  %v2748_v35 = vrot.slane %v2392_v31, %v2191_v11 }
 0x174   : > { %p1899_p2 = pnand %p1898_p12, %p2755_p1  ;;  %p1906_p8 = por %p1905_p7, %p1904_p4 }
 0x176   : > { %p1900_p3 = pneg %p1899_p2 }
 0x178   : > { %p1907_p11 = pnand %p1906_p8, %p1900_p3 }
 0x1d3   : > { %v787_v42 = vpop.permute.xlu1 %786  ;;  %v729_v51 = vpop.permute.xlu0 %728 }
 0x1d4   : > { %v789_v15 = vmul.f32 %v787_v42, %v769_v46  ;;  %v731_v27 = vmul.f32 %v729_v51, %v710_v40  ;;  %v732_v23 = vmul.f32 %v729_v51, %v714_v43  ;;  %v733_v48 = vmul.f32 %v729_v51, %v2415_v44 }
 0x1d5   : > { %v734_v46 = vmul.f32 %v729_v51, %v2418_v45  ;;  %v790_v1 = vmul.f32 %v787_v42, %v2744_v56  ;;  %v791_v14 = vmul.f32 %v787_v42, %v2438_v55  ;;  %v792_v6 = vmul.f32 %v787_v42, %v781_v59 }
 0x1d6   : > { %v735_v2 = vadd.f32 %v731_v27, %v676_v25  ;;  %v736_v40 = vadd.f32 %v732_v23, %v677_v8  ;;  %v737_v24 = vadd.f32 %v733_v48, %v678_v3  ;;  %v2745_v43 = vrot.slane %v2333_v60, %v2191_v11 }
 0x1d7   : > { %v738_v49 = vadd.f32 %v734_v46, %v679_v7  ;;  %v959_v0 = vpop.permute.xlu1 %958  ;;  %v2578_v45 = vmul.f32 %v2406_v39, %v2273_v32  ;;  %v901_v55 = vpop.permute.xlu0 %900  ;;  %v2746_v59 = vrot.slane %v2400_v37, %v2191_v11  ;;  %v2747_v60 = vrot.slane %v2389_v30, %v2191_v11 }
 0x1d8   : > { %v2570_v44 = vmul.f32 %v2745_v43, %v2273_v32  ;;  %v793_v25 = vadd.f32 %v789_v15, %v735_v2  ;;  %v794_v3 = vadd.f32 %v790_v1, %v736_v40  ;;  %v795_v4 = vadd.f32 %v791_v14, %v737_v24 }
 0x1d9   : > { %v961_v8 = vmul.f32 %v959_v0, %v2746_v59  ;;  %v796_v7 = vadd.f32 %v792_v6, %v738_v49  ;;  %v903_v42 = vmul.f32 %v901_v55, %v2747_v60  ;;  %v904_v51 = vmul.f32 %v901_v55, %v2748_v35 }
 0x1da   : > { %v905_v32 = vmul.f32 %v901_v55, %v2463_v13  ;;  %v906_v39 = vmul.f32 %v901_v55, %v2466_v16  ;;  %v848_v27 = vadd.f32 %v2263_v28, %v793_v25  ;;  %v849_v37 = vadd.f32 %v845_v58, %v794_v3 }
 0x1db   : > { %v850_v23 = vadd.f32 %v846_v18, %v795_v4  ;;  %v851_v15 = vadd.f32 %v847_v22, %v796_v7  ;;  %v1131_v48 = vpop.permute.xlu1 %1130  ;;  %v2749_v49 = vrot.slane %v2403_v38, %v2191_v11  ;;  %v963_v30 = vmul.f32 %v959_v0, %v2473_v26  ;;  %v1073_v31 = vpop.permute.xlu0 %1072 }
 0x1dc   : > { %v964_v56 = vmul.f32 %v959_v0, %v2476_v34  ;;  %v2750_v13 = vrot.slane %v2448_v62, %v2191_v11  ;;  %v907_v16 = vadd.f32 %v903_v42, %v848_v27  ;;  %v908_v14 = vadd.f32 %v904_v51, %v849_v37 }
 0x1dd   : > { %v962_v46 = vmul.f32 %v959_v0, %v2749_v49  ;;  %v909_v28 = vadd.f32 %v905_v32, %v850_v23  ;;  %v910_v58 = vadd.f32 %v906_v39, %v851_v15  ;;  %v2751_v18 = vrot.slane %v2427_v50, %v2191_v11 }
 0x1de   : > { %v1133_v1 = vmul.f32 %v1131_v48, %v2750_v13  ;;  %v1280_v38 = vcombine.high %v2546_v21, %v2546_v21  ;;  %v1281_v26 = vcombine.high %v2549_v9, %v2549_v9  ;;  %v1285_v34 = vrot.slane %v2546_v21, %v2191_v11 }
 0x1df   : > { %v1075_v22 = vmul.f32 %v1073_v31, %v2751_v18  ;;  %v965_v6 = vadd.f32 %v961_v8, %v907_v16  ;;  %v966_v62 = vadd.f32 %v962_v46, %v908_v14  ;;  %v967_v2 = vadd.f32 %v963_v30, %v909_v28  ;;  %v1303_v3 = vpop.permute.xlu1 %1302 }
 0x1e0   : > { %v968_v40 = vadd.f32 %v964_v56, %v910_v58  ;;  %v2752_v24 = vrot.slane %v2430_v52, %v2191_v11  ;;  %v1077_v50 = vmul.f32 %v1073_v31, %v2498_v29  ;;  %v1078_v43 = vmul.f32 %v1073_v31, %v2501_v54 }
 0x1e1   : > { %v1289_v55 = vrot.slane %v2549_v9, %v2191_v11  ;;  %v1020_v59 = vadd.f32 %v2241_v20, %v965_v6  ;;  %v1021_v25 = vadd.f32 %v2509_v53, %v966_v62  ;;  %v1022_v21 = vadd.f32 %v2513_v12, %v967_v2  ;;  %v1245_v53 = vpop.permute.xlu0 %1244  ;;  %v1349_v12 = vld [vmem:[%s2712_s5 + $0x30] sm:$0xff] }
 0x1e2   : > { %v1076_v0 = vmul.f32 %v1073_v31, %v2752_v24  ;;  %v1023_v8 = vadd.f32 %v2517_v19, %v968_v40  ;;  %v2753_v52 = vrot.slane %v2451_v63, %v2191_v11  ;;  %v1135_v29 = vmul.f32 %v1131_v48, %v2523_v61  ;;  %v1350_v63 = vld [vmem:[%s2712_s5 + $0x38] sm:$0xff]  ;;  %v1435_v24 = vld [vmem:[%s2713_s6] sm:$0xff] }
 0x1e3   : > { %v1136_v54 = vmul.f32 %v1131_v48, %v2526_v47  ;;  %v1293_v7 = vrot.slane %v1280_v38, %v2191_v11  ;;  %v1079_v9 = vadd.f32 %v1075_v22, %v1020_v59  ;;  %v1081_v20 = vadd.f32 %v1077_v50, %v1022_v21 }
 0x1e4   : > { %v1134_v4 = vmul.f32 %v1131_v48, %v2753_v52  ;;  %v1080_v60 = vadd.f32 %v1076_v0, %v1021_v25  ;;  %v1082_v42 = vadd.f32 %v1078_v43, %v1023_v8  ;;  %v1297_v19 = vrot.slane %v1281_v26, %v2191_v11  ;;  %v1436_v0 = vld [vmem:[%s2713_s6 + $0x8] sm:$0xff]  ;;  %v1668_v43 = vld [vmem:[%s2714_s7] ss:$0 sm:$0xff] }
 0x1e5   : > { %v1305_v61 = vmul.f32 %v1303_v3, %v1285_v34  ;;  %v1306_v35 = vmul.f32 %v1303_v3, %v1289_v55  ;;  %v1724_v47 = vpack.c.bf16 %v1350_v63, %v1349_v12  ;;  %v1137_v51 = vadd.f32 %v1133_v1, %v1079_v9 }
 0x1e6   : > { %v1138_v32 = vadd.f32 %v1134_v4, %v1080_v60  ;;  %v1139_v39 = vadd.f32 %v1135_v29, %v1081_v20  ;;  %v1140_v27 = vadd.f32 %v1136_v54, %v1082_v42  ;;  %v1247_v37 = vmul.f32 %v1245_v53, %v1226_v10 }
 0x1e7   : > { %v2754_v23 = vrot.slane %v2494_v5, %v2191_v11  ;;  %v1249_v48 = vmul.f32 %v1245_v53, %v2543_v57  ;;  %v1250_v49 = vmul.f32 %v1245_v53, %v2564_v41  ;;  %1725 = vmatpush3.bf16.msra.mxu0 %v1724_v47  ;;  %v1192_v46 = vadd.f32 %v2276_v33, %v1137_v51 }
 0x1e8   : > { %v1193_v30 = vadd.f32 %v2570_v44, %v1138_v32  ;;  %v1194_v56 = vadd.f32 %v2574_v17, %v1139_v39  ;;  %v1195_v31 = vadd.f32 %v2578_v45, %v1140_v27  ;;  %v1307_v13 = vmul.f32 %v1303_v3, %v1293_v7 }
 0x1e9   : > { %v1248_v15 = vmul.f32 %v1245_v53, %v2754_v23  ;;  %v1308_v36 = vmul.f32 %v1303_v3, %v1297_v19  ;;  %v1251_v10 = vadd.f32 %v1247_v37, %v1192_v46  ;;  %v1982_v5 = vmov 0.0   ;;  %v1670_v3 = vld [vmem:[%s2715_s8] ss:$0 sm:$0xff] }
 0x1ea   : > { %v1253_v16 = vadd.f32 %v1249_v48, %v1194_v56  ;;  %v1254_v11 = vadd.f32 %v1250_v49, %v1195_v31  ;;  %1704 = vmatprep.mubr.msk.f32.mxu0 %vm1981_vm2, %v1982_v5  ;;  %1711 = vmatprep.mubr.msk.f32.mxu1 %vm1981_vm2, %v1982_v5  ;;  %v1727_v50 = vpack.c.bf16 %v1436_v0, %v1435_v24 }
 0x1eb   : > { %v1252_v1 = vadd.f32 %v1248_v15, %v1193_v30  ;;  %v1309_v57 = vadd.f32 %v1305_v61, %v1251_v10 }
 0x1ec   : > { %v1311_v41 = vadd.f32 %v1307_v13, %v1253_v16  ;;  %v1312_v33 = vadd.f32 %v1308_v36, %v1254_v11  ;;  %1728 = vmatpush3.bf16.msra.mxu1 %v1727_v50 }
 0x1ed   : > { %v1310_v14 = vadd.f32 %v1306_v35, %v1252_v1  ;;  %v1317_v22 = vmul.f32 0.1, %v1309_v57  ;;  %vm1313_vm6 = vcmp.ge.f32.partialorder %v1309_v57, 0.0 }
 0x1ee   : > { %vm1315_vm3 = vcmp.ge.f32.partialorder %v1311_v41, 0.0  ;;  %v1319_v44 = vmul.f32 0.1, %v1311_v41  ;;  %v1320_v58 = vmul.f32 0.1, %v1312_v33  ;;  %vm1316_vm5 = vcmp.ge.f32.partialorder %v1312_v33, 0.0 }
 0x1ef   : > { %vm1314_vm4 = vcmp.ge.f32.partialorder %v1310_v14, 0.0  ;;  %v1318_v17 = vmul.f32 0.1, %v1310_v14  ;;  %v1321_v26 = vsel %vm1313_vm6, %v1309_v57, %v1317_v22 }
 0x1f0   : > { %v1323_v28 = vsel %vm1315_vm3, %v1311_v41, %v1319_v44  ;;  %v1324_v18 = vsel %vm1316_vm5, %v1312_v33, %v1320_v58 }
 0x1f1   : > { %v1322_v45 = vsel %vm1314_vm4, %v1310_v14, %v1318_v17  ;;  %1330 = vrot.lane.b32.xlu1 %v1323_v28, %s1983_s11 }
 0x1f2   : > { %1326 = vrot.lane.b32.xlu0 %v1322_v45, %s1984_s3  ;;  %s2664_s3 = scalar_lea.hbm %s2716_s9, %s1673_s27 }
 0x1f6   : > { %1334 = vrot.lane.b32.xlu0 %v1324_v18, %s1985_s14  ;;  %s1519_s14 = scalar_lea.sflag [#allocation4], %s365_s29 }
 0x263   : > { %v1331_v34 = vpop.permute.xlu1 %1330 }
 0x264   : > { %v1327_v38 = vpop.permute.xlu0 %1326 }
 0x265   : > { %v1338_v6 = vsel %vm1337_vm7, %v1321_v26, %v1327_v38 }
 0x266   : > { %v1340_v2 = vsel %vm1339_vm8, %v1338_v6, %v1331_v34 }
 0x268   : > { %v1335_v62 = vpop.permute.xlu0 %1334 }
 0x269   : > { %v1342_v40 = vsel %vm1341_vm9, %v1340_v2, %v1335_v62 }
 0x26a   : > { %1705 = vmatmul.mubr.msk.f32.vlgmr.msra.gmra.mrb[0].mxu0 %vm1358_vm10, %v1342_v40 }
 0x33d   : > { %v1428_v55 = vpop.f32.mrb[0].mxu0 }
 0x33e   : > { %v1429_v59 = vadd.f32 %v1668_v43, %v1428_v55  ;;  %v1706_v25 = vpop.f32.mrb[1].mxu0 }
 0x340   : > { %vm1432_vm11 = vcmp.ge.f32.partialorder %v1429_v59, 0.0  ;;  %v1433_v21 = vmul.f32 0.1, %v1429_v59 }
 0x342   : > { %v1434_v8 = vsel %vm1432_vm11, %v1429_v59, %v1433_v21 }
 0x343   : > { %1712 = vmatmul.mubr.msk.f32.vlgmr.msra.gmra.mrb[0].mxu1 %vm1337_vm7, %v1434_v8 }
 0x416   : > { %v1513_v52 = vpop.f32.mrb[0].mxu1 }
 0x417   : > { %v1514_v4 = vadd.f32 %v1670_v3, %v1513_v52  ;;  %v1713_v29 = vpop.f32.mrb[1].mxu1 }
 0x419   : > { %1517 = vst.msk [vmem:[%s367_s23] sm:$0xff] %vm1337_vm7, %v1514_v4 }
 0x41a   : > { %1910 = shalt.err (!%p1907_p11)
}
 0x41b   : > { %s1911_s21 = scalar_lea.hbm %s2664_s3, 128  ;;  %s1915_s29 = scalar_lea.hbm %s2716_s9, 256 }
 0x41c   : > { %p1912_p5 = scmp.ne.s32.totalorder %s2664_s3, %s1911_s21  ;;  %p1916_p9 = scmp.lt.u32.totalorder %s2664_s3, %s2716_s9 }
 0x41d   : > { %p1917_p10 = scmp.lt.u32.totalorder %s1915_s29, %s1911_s21  ;;  %p1919_p12 = scmp.lt.u32.totalorder %s1911_s21, %s2664_s3 }
 0x41e   : > { %p1913_p0 = pnand %p1912_p5, %p2755_p1 }
 0x41f   : > { %p1918_p13 = por %p1917_p10, %p1916_p9 }
 0x420   : > { %p1914_p6 = pneg %p1913_p0 }
 0x421   : > { %p1920_p2 = por %p1919_p12, %p1918_p13 }
 0x423   : > { %p1921_p3 = pnand %p1920_p2, %p1914_p6 }
 0x425   : > { %1924 = shalt.err (!%p1921_p3)
}
 0x426   : > { %1741 = dma.vmem_to_hbm [thread:$0]  (%p2755_p1), %s2666_s26, 128, %s2664_s3, %s1519_s14  }
 0x427 PF: > { %s2756_s25 = sld [smem:[#allocation15_spill]]  ;;  %p1763_p4 = scmp.ge.s32.totalorder %s1967_s12, 2 }
 0x428   : > { %s1544_s27 = sand.u32 1, %s1955_s30  }
 0x429   : > { %s1545_s23 = scalar_lea.sflag [#allocation4], %s1544_s27 }
 0x42d   : > { %p2757_p7 = scmp.ne.s32.totalorder %s2756_s25, 0 }
 0x42f   : > { %p1754_p8 = pnand %p1763_p4, %p2757_p7 }
 0x431   : > { %1950 = dma.done.wait (!%p1754_p8), %s1545_s23, 128  }
 0x432   : > { %1952 = vsyncadd (!%p1754_p8), %s1545_s23, 4294967168  ;;  %s2758_s12 = sld [smem:[#allocation13_spill]]  ;;  %s2759_s28 = sld [smem:[#allocation12_spill]] }
 0x433   : > { %s2760_s11 = sld [smem:[#allocation14_spill]]  ;;  %s2761_s30 = smov %s1959_s10 }
 0x438   : > { %p21_p11 = scmp.ge.s32.totalorder %s2758_s12, 4   ;;  %s2762_s10 = smov %s2759_s28 }
 0x43a   :  { %23 = sbr.rel (!%p21_p11) target bundleno = 7 (0x7), region = 117 }
 0x441   :  { %1550 = vsyncpa [#allocation3], 1 }
 0x442   :  { %1552 = vsyncpa [#allocation3 + $0x1], 1 }
 0x443   :  { %1553 = vsyncpa [#allocation6], 1 }
 0x444   :  { %1554 = vsyncpa [#allocation4], 1 }
 0x445   :  { %1556 = vsyncpa [#allocation4 + $0x1], 1 }

</bundles_post_ra>
